<compile_context>
chip_gen: v7x
topology: tpu7x:2x2x1
jax: 0.10.0
libtpu: 0.0.40
codegen_flags: <defaults>
</compile_context>

<pallas_src>
import jax
import jax.numpy as jnp
from jax.experimental import pallas as pl
from jax.experimental.pallas import tpu as pltpu

EPS = 1e-8
_LANES = 128
_MAX_BLOCK_ROWS = 256
_MAX_BLOCK_T = 4096  # cap for chunked-T blocks (bounds in-kernel unroll + f32 temps)


def _round_up(x, m):
    return ((x + m - 1) // m) * m


def _cdiv(a, b):
    return (a + b - 1) // b


def _tpu_generation_params():
    """Return (input-block VMEM budget, scoped vmem_limit_bytes, tensorcores/chip)."""
    try:
        info = pltpu.get_tpu_info()
        vmem_phys = int(info.vmem_capacity_bytes)
        cores = 1
        for attr in ("num_cores", "tensorcores_per_chip", "core_count"):
            v = getattr(info, attr, None)
            if v:
                cores = int(v)
                break
        small_vmem = vmem_phys <= (64 << 20)  # v7x: 64 MiB physical VMEM per TC
        if small_vmem:
            cores = max(cores, 2)             # v7x has 2 TCs per chip
            return (16 << 20), (40 << 20), cores
        return (32 << 20), (96 << 20), cores
    except Exception:
        # Unknown chip: conservative settings that are safe on 64 MiB VMEM parts.
        return (16 << 20), (40 << 20), 2


def _choose_tiles(n_rows, t, itemsize_sum, row_align, budget, split_rows,
                  block_rows=None, block_t=None):
    """Pick (block_rows, block_t) so 2 inputs x 2 pipeline buffers fit budget."""
    user_rows = block_rows is not None
    max_block_elems = max(budget // (2 * itemsize_sum), row_align * _LANES)

    if block_rows is None:
        block_rows = min(_round_up(n_rows, row_align), _MAX_BLOCK_ROWS)
        # Guarantee >= 2 row blocks on multi-TC chips so the "parallel" axis
        # can shard across both TensorCores.
        if split_rows and n_rows >= 2 * row_align:
            block_rows = min(block_rows, _round_up(_cdiv(n_rows, 2), row_align))
        if block_t is None:
            # Prefer shrinking rows so a single full-T block fits (kills the
            # k loop, the tail mask and the accumulators entirely).
            rows_full_t = (max_block_elems // max(t, 1)) // row_align * row_align
            if rows_full_t >= row_align:
                block_rows = min(block_rows, rows_full_t)
            # else: full T does not fit even at minimum rows -> chunk T below,
            # keeping block_rows large to amortize per-step overhead.
    else:
        block_rows = max(_round_up(block_rows, row_align), row_align)

    if block_t is None:
        per_row = max_block_elems // block_rows
        if per_row >= t:
            block_t = t
        else:
            block_t = min(max((per_row // _LANES) * _LANES, _LANES), _MAX_BLOCK_T)

    # Normalize: full-T block, or a 128-aligned chunk (lane rule).
    if block_t >= t:
        block_t = t
    elif block_t % _LANES != 0:
        block_t = max((block_t // _LANES) * _LANES, _LANES)
        if block_t >= t:
            block_t = t

    # Safety: if rows were auto-chosen but a user block_t pushes past budget.
    if not user_rows:
        while block_rows > row_align and block_rows * block_t > max_block_elems:
            block_rows = max(_round_up(block_rows // 2, row_align), row_align)

    return block_rows, block_t


def _sisdr_from_moments(d, te, ee):
    alpha = d / (te + EPS)                  # scaled_targets = alpha * tgt
    num = alpha * alpha * te                # sum(scaled_targets ** 2)
    den = ee - 2.0 * alpha * d + num + EPS  # sum(e_noise ** 2) + EPS
    return 10.0 * jnp.log10(num / den + EPS)


def _full_t_kernel(est_ref, tgt_ref, out_ref):
    # Single-chunk path: whole waveform resident, one reduce per moment.
    est = est_ref[...].astype(jnp.float32)
    tgt = tgt_ref[...].astype(jnp.float32)
    d = jnp.sum(est * tgt, axis=-1, keepdims=True)
    te = jnp.sum(tgt * tgt, axis=-1, keepdims=True)
    ee = jnp.sum(est * est, axis=-1, keepdims=True)
    out_ref[...] = _sisdr_from_moments(d, te, ee)


def _make_chunked_kernel(t_total, block_t, block_rows):
    groups = block_t // _LANES
    needs_mask = (t_total % block_t) != 0

    def accumulate(est, tgt, d_acc, te_acc, ee_acc):
        # Lane-wise partial sums over static 128-wide slices: pure VPU vreg
        # adds, no per-chunk XLU reduce, single acc read-modify-write per step.
        e0 = est[:, 0:_LANES]
        t0 = tgt[:, 0:_LANES]
        d_p, te_p, ee_p = e0 * t0, t0 * t0, e0 * e0
        for g in range(1, groups):
            sl = slice(g * _LANES, (g + 1) * _LANES)
            e = est[:, sl]
            t = tgt[:, sl]
            d_p = d_p + e * t
            te_p = te_p + t * t
            ee_p = ee_p + e * e
        d_acc[...] += d_p
        te_acc[...] += te_p
        ee_acc[...] += ee_p

    def kernel(est_ref, tgt_ref, out_ref, d_acc, te_acc, ee_acc):
        k = pl.program_id(1)
        nk = pl.num_programs(1)

        @pl.when(k == 0)
        def _init():
            d_acc[...] = jnp.zeros_like(d_acc)
            te_acc[...] = jnp.zeros_like(te_acc)
            ee_acc[...] = jnp.zeros_like(ee_acc)

        if needs_mask:
            # Tail mask gated to the LAST T chunk only; all other chunks run
            # the plain unmasked accumulate (no iota/compare/select work).
            @pl.when(k < nk - 1)
            def _plain():
                accumulate(est_ref[...].astype(jnp.float32),
                           tgt_ref[...].astype(jnp.float32),
                           d_acc, te_acc, ee_acc)

            @pl.when(k == nk - 1)
            def _masked():
                est = est_ref[...].astype(jnp.float32)
                tgt = tgt_ref[...].astype(jnp.float32)
                col = jax.lax.broadcasted_iota(jnp.int32, est.shape, 1)
                valid = (k * block_t + col) < t_total
                est = jnp.where(valid, est, 0.0)
                tgt = jnp.where(valid, tgt, 0.0)
                accumulate(est, tgt, d_acc, te_acc, ee_acc)
        else:
            accumulate(est_ref[...].astype(jnp.float32),
                       tgt_ref[...].astype(jnp.float32),
                       d_acc, te_acc, ee_acc)

        @pl.when(k == nk - 1)
        def _finalize():
            # The only cross-lane (XLU) reduces + narrow (rows,1) store.
            d = jnp.sum(d_acc[...], axis=-1, keepdims=True)
            te = jnp.sum(te_acc[...], axis=-1, keepdims=True)
            ee = jnp.sum(ee_acc[...], axis=-1, keepdims=True)
            out_ref[...] = _sisdr_from_moments(d, te, ee)

    return kernel


def sisdr_loss(est_targets, targets, *, block_rows=None, block_t=None):
    """Negative mean SI-SDR (dB). Matches SISDR.forward for 3-D or 4-D inputs."""
    assert est_targets.shape == targets.shape
    assert est_targets.ndim in (3, 4)
    *lead, T = targets.shape
    N = 1
    for d in lead:
        N *= d

    # Layout-preserving reshape only: no pad, no dtype upcast in the wrapper.
    est2d = est_targets.reshape(N, T)
    tgt2d = targets.reshape(N, T)

    itemsize_sum = est2d.dtype.itemsize + tgt2d.dtype.itemsize
    # Sublane-tile row alignment: 8 (f32), 16 (bf16/f16), 32 (int8/fp8).
    row_align = max(8, 32 // min(est2d.dtype.itemsize, tgt2d.dtype.itemsize))

    budget, vmem_limit, cores = _tpu_generation_params()
    block_rows, block_t = _choose_tiles(
        N, T, itemsize_sum, row_align, budget, cores >= 2, block_rows, block_t)

    out_shape = jax.ShapeDtypeStruct((N, 1), jnp.float32)

    if block_t >= T:
        # Full-T path: 1-D grid over row blocks, no accumulators, no mask.
        grid = (_cdiv(N, block_rows),)
        sdr = pl.pallas_call(
            _full_t_kernel,
            out_shape=out_shape,
            grid_spec=pltpu.PrefetchScalarGridSpec(
                num_scalar_prefetch=0,
                grid=grid,
                in_specs=[
                    pl.BlockSpec((block_rows, T), lambda i: (i, 0)),
                    pl.BlockSpec((block_rows, T), lambda i: (i, 0)),
                ],
                out_specs=pl.BlockSpec((block_rows, 1), lambda i: (i, 0)),
            ),
            compiler_params=pltpu.CompilerParams(
                dimension_semantics=("parallel",),
                vmem_limit_bytes=vmem_limit,
            ),
        )(est2d, tgt2d)
    else:
        assert block_t % _LANES == 0
        grid = (_cdiv(N, block_rows), _cdiv(T, block_t))
        sdr = pl.pallas_call(
            _make_chunked_kernel(T, block_t, block_rows),
            out_shape=out_shape,
            grid_spec=pltpu.PrefetchScalarGridSpec(
                num_scalar_prefetch=0,
                grid=grid,
                in_specs=[
                    pl.BlockSpec((block_rows, block_t), lambda i, k: (i, k)),
                    pl.BlockSpec((block_rows, block_t), lambda i, k: (i, k)),
                ],
                out_specs=pl.BlockSpec((block_rows, 1), lambda i, k: (i, 0)),
                scratch_shapes=[pltpu.VMEM((block_rows, _LANES), jnp.float32)] * 3,
            ),
            compiler_params=pltpu.CompilerParams(
                dimension_semantics=("parallel", "arbitrary"),
                vmem_limit_bytes=vmem_limit,
            ),
        )(est2d, tgt2d)

    return -jnp.mean(sdr[:, 0])


def _sisdr_ref(est_targets, targets):
    # pure-JAX reference mirroring the PyTorch forward
    last = -1
    pair_wise_dot = jnp.sum(est_targets * targets, axis=last, keepdims=True)
    s_target_energy = jnp.sum(targets ** 2, axis=last, keepdims=True) + EPS
    scaled_targets = pair_wise_dot * targets / s_target_energy
    e_noise = est_targets - scaled_targets
    pair_wise_sdr = jnp.sum(scaled_targets ** 2, axis=last) / (
        jnp.sum(e_noise ** 2, axis=last) + EPS
    )
    pair_wise_sdr = 10.0 * jnp.log10(pair_wise_sdr + EPS)
    return -jnp.mean(pair_wise_sdr)


if __name__ == "__main__":
    key = jax.random.PRNGKey(0)
    k1, k2, k3, k4 = jax.random.split(key, 4)
    B, S, C, T = 2, 2, 4, 1000  # (batch, sources, channels, time)
    targets = jax.random.normal(k1, (B, S, C, T), dtype=jnp.float32)
    est_targets = targets + 0.3 * jax.random.normal(k2, (B, S, C, T), dtype=jnp.float32)

    ref = _sisdr_ref(est_targets, targets)

    # 1) Default tiling: full-T blocks, single-pass kernel (no T loop / mask).
    loss = jax.block_until_ready(sisdr_loss(est_targets, targets))
    assert jnp.allclose(loss, ref, rtol=1e-3, atol=1e-3), (loss, ref)

    # 2) Forced chunked-T path: 3 full 256-chunks + a 232-wide masked tail,
    #    exercising lane-wise accumulation and the last-chunk-only mask.
    loss_tiled = jax.block_until_ready(
        sisdr_loss(est_targets, targets, block_rows=8, block_t=256)
    )
    assert jnp.allclose(loss_tiled, ref, rtol=1e-3, atol=1e-3), (loss_tiled, ref)

    # 3) 3-D input with a partial row block (OOB rows' writes are dropped).
    tgt3 = jax.random.normal(k3, (3, 2, 777), dtype=jnp.float32)
    est3 = tgt3 + 0.5 * jax.random.normal(k4, (3, 2, 777), dtype=jnp.float32)
    ref3 = _sisdr_ref(est3, tgt3)
    loss3 = jax.block_until_ready(sisdr_loss(est3, tgt3))
    assert jnp.allclose(loss3, ref3, rtol=1e-3, atol=1e-3), (loss3, ref3)

    # 4) bf16 streaming path (in-kernel f32 cast, 16-row sublane alignment).
    est_bf = est_targets.astype(jnp.bfloat16)
    tgt_bf = targets.astype(jnp.bfloat16)
    ref_bf = _sisdr_ref(est_bf.astype(jnp.float32), tgt_bf.astype(jnp.float32))
    loss_bf = jax.block_until_ready(sisdr_loss(est_bf, tgt_bf))
    assert jnp.allclose(loss_bf, ref_bf, rtol=1e-3, atol=1e-3), (loss_bf, ref_bf)

    print("KERNEL_OK")
</pallas_src>

<mosaic_0001>
module attributes {stable_mosaic.version = 11 : i64} {
  func.func @_full_t_kernel(%arg0: i32, %arg1: memref<8x1000xf32, #tpu.memory_space<vmem>>, %arg2: memref<8x1000xf32, #tpu.memory_space<vmem>>, %arg3: memref<8x1xf32, #tpu.memory_space<vmem>>) attributes {dimension_semantics = [#tpu.dimension_semantics<parallel>], iteration_bounds = array<i64: 2>, scalar_prefetch = 0 : i64, scratch_operands = 0 : i64, tpu.core_type = #tpu.core_type<tc>, window_params = [{transform_indices = @transform_0, window_bounds = array<i64: 8, 1000>}, {transform_indices = @transform_1, window_bounds = array<i64: 8, 1000>}, {transform_indices = @transform_2, window_bounds = array<i64: 8, 1>}]} {
    %c0 = arith.constant 0 : index
    %c0_0 = arith.constant 0 : index
    %0 = vector.load %arg1[%c0, %c0_0] : memref<8x1000xf32, #tpu.memory_space<vmem>>, vector<8x1000xf32>
    %c0_1 = arith.constant 0 : index
    %c0_2 = arith.constant 0 : index
    %1 = vector.load %arg2[%c0_1, %c0_2] : memref<8x1000xf32, #tpu.memory_space<vmem>>, vector<8x1000xf32>
    %2 = arith.mulf %0, %1 : vector<8x1000xf32>
    %cst = arith.constant dense<0.000000e+00> : vector<8xf32>
    %3 = vector.multi_reduction <add>, %2, %cst [1] : vector<8x1000xf32> to vector<8xf32>
    %4 = vector.shape_cast %3 : vector<8xf32> to vector<8x1xf32>
    %5 = arith.mulf %1, %1 : vector<8x1000xf32>
    %cst_3 = arith.constant dense<0.000000e+00> : vector<8xf32>
    %6 = vector.multi_reduction <add>, %5, %cst_3 [1] : vector<8x1000xf32> to vector<8xf32>
    %7 = vector.shape_cast %6 : vector<8xf32> to vector<8x1xf32>
    %8 = arith.mulf %0, %0 : vector<8x1000xf32>
    %cst_4 = arith.constant dense<0.000000e+00> : vector<8xf32>
    %9 = vector.multi_reduction <add>, %8, %cst_4 [1] : vector<8x1000xf32> to vector<8xf32>
    %10 = vector.shape_cast %9 : vector<8xf32> to vector<8x1xf32>
    %cst_5 = arith.constant 9.99999993E-9 : f32
    %11 = vector.broadcast %cst_5 : f32 to vector<8x1xf32>
    %12 = arith.addf %7, %11 : vector<8x1xf32>
    %13 = arith.divf %4, %12 : vector<8x1xf32>
    %14 = arith.mulf %13, %13 : vector<8x1xf32>
    %15 = arith.mulf %14, %7 : vector<8x1xf32>
    %cst_6 = arith.constant 2.000000e+00 : f32
    %16 = vector.broadcast %cst_6 : f32 to vector<8x1xf32>
    %17 = arith.mulf %16, %13 : vector<8x1xf32>
    %18 = arith.mulf %17, %4 : vector<8x1xf32>
    %19 = arith.subf %10, %18 : vector<8x1xf32>
    %20 = arith.addf %19, %15 : vector<8x1xf32>
    %cst_7 = arith.constant 9.99999993E-9 : f32
    %21 = vector.broadcast %cst_7 : f32 to vector<8x1xf32>
    %22 = arith.addf %20, %21 : vector<8x1xf32>
    %23 = arith.divf %15, %22 : vector<8x1xf32>
    %cst_8 = arith.constant 9.99999993E-9 : f32
    %24 = vector.broadcast %cst_8 : f32 to vector<8x1xf32>
    %25 = arith.addf %23, %24 : vector<8x1xf32>
    %26 = math.log %25 : vector<8x1xf32>
    %cst_9 = arith.constant 0.434294492 : f32
    %27 = vector.broadcast %cst_9 : f32 to vector<8x1xf32>
    %28 = arith.mulf %26, %27 : vector<8x1xf32>
    %cst_10 = arith.constant 1.000000e+01 : f32
    %29 = vector.broadcast %cst_10 : f32 to vector<8x1xf32>
    %30 = arith.mulf %29, %28 : vector<8x1xf32>
    %c0_11 = arith.constant 0 : index
    %c0_12 = arith.constant 0 : index
    %31 = vector.load %arg3[%c0_11, %c0_12] : memref<8x1xf32, #tpu.memory_space<vmem>>, vector<8x1xf32>
    tpu.vector_store %arg3[%c0_11, %c0_12], %30 {strides = array<i32>} : memref<8x1xf32, #tpu.memory_space<vmem>>, vector<8x1xf32>,
    return
  }
  func.func @transform_0(%arg0: i32) -> (i32, i32) {
    %c0_i32 = arith.constant 0 : i32
    %c0_i32_0 = arith.constant 0 : i32
    return %arg0, %c0_i32 : i32, i32
  }
  func.func @transform_1(%arg0: i32) -> (i32, i32) {
    %c0_i32 = arith.constant 0 : i32
    %c0_i32_0 = arith.constant 0 : i32
    return %arg0, %c0_i32 : i32, i32
  }
  func.func @transform_2(%arg0: i32) -> (i32, i32) {
    %c0_i32 = arith.constant 0 : i32
    %c0_i32_0 = arith.constant 0 : i32
    return %arg0, %c0_i32 : i32, i32
  }
}

</mosaic_0001>

<bundles_post_ra>
// kernel: tpu_custom_call.1
= control target key start
LH: loop header
LB: loop body
LE: loop exit
PB: predicated region body
PF: predicated region fallthrough
CT: control target
= control target key end

     0   :  { %7 = vsyncpa [#allocation3], 0  ;;  %s727_s0 = inlined_call_operand.hbm [shape: f32[16,1000], index: 0, kind: input, shape index: {}]   ;;  %s728_s1 = inlined_call_operand.hbm [shape: f32[16,1000], index: 1, kind: input, shape index: {}]   ;;  %s729_s2 = inlined_call_operand.vmem [shape: f32[16,1], index: 2, kind: output, shape index: {}]  }
   0x1   :  { %9 = vsyncpa [#allocation3 + $0x1], 0 }
   0x2   :  { %10 = vsyncpa [#allocation5], 0 }
   0x3   :  { %12 = vsyncpa [#allocation5 + $0x1], 0  ;;  %s560_s9 = smov 0   ;;  %s562_s10 = smov 0  }
   0x4   :  { %s564_s11 = smov 0   ;;  %s566_s12 = smov 0  }
   0x5 LB: > { %s579_s13 = sadd.s32 4294967295, %s541_s12   ;;  %s582_s14 = sadd.s32 1, %s541_s12   ;;  %s541_s12 = sphi %s566_s12, %s741_s12   ;;  %s537_s11 = sphi %s564_s11, %s740_s11   ;;  %s533_s10 = sphi %s562_s10, %s739_s10   ;;  %s529_s9 = sphi %s560_s9, %s738_s9  }
   0x6   : > { %s22_s15 = ssub.s32 %s541_s12, %s582_s14  ;;  %s25_s16 = sadd.s32 1, %s537_s11 }
   0x7   : > { %p23_p0 = scmp.eq.s32.totalorder %s22_s15, 0  ;;  %p32_p1 = scmp.ne.s32.totalorder %s537_s11, %s533_s10 }
   0x8   : > { %p33_p2 = scmp.eq.s32.totalorder %s541_s12, 0  ;;  %p38_p3 = scmp.ne.s32.totalorder %s533_s10, %s529_s9 }
   0x9   : > { %s592_s17 = scalar_select %p23_p0, %s537_s11, %s25_s16  }
   0xa   : > { %p34_p4 = por %p33_p2, %p32_p1  ;;  %p39_p5 = scmp.eq.s32.totalorder %s579_s13, 0 }
   0xb   : > { %p404_p6 = scmp.lt.s32.totalorder %s541_s12, 2  ;;  %s601_s19 = sand.u32 1, %s537_s11  }
   0xc   : > { %p596_p7 = por %p39_p5, %p38_p3  ;;  %s379_s20 = sshll.u32 %s601_s19, 6 }
   0xd   : > { %s391_s21 = sshll.u32 %s541_s12, 10  ;;  %s118_s25 = scalar_lea.vmem [#allocation2], %s379_s20 }
   0xe   : > { %s731_s18 = scalar_select %p596_p7, 1, 0 }
   0xf   : > { %s610_s24 = scalar_lea.hbm %s727_s0, %s391_s21  ;;  %s126_s26 = sshll.u32 %s118_s25, 4  ;;  %s614_s26 = int_to_ptr.vmem [resolvable:$true] %s126_s26 }
  0x10   : > { %p616_p8 = pnand %p404_p6, %p34_p4  ;;  %s115_s28 = scalar_lea.sflag [#allocation3], %s601_s19 }
  0x11   : > { %s443_s29 = scalar_lea.hbm %s610_s24, 1024  ;;  %s448_s4 = scalar_lea.hbm %s727_s0, 2048 }
  0x12   : > { %p444_p11 = scmp.ne.s32.totalorder %s610_s24, %s443_s29  ;;  %p445_p12 = pneg %p616_p8 }
  0x13   : > { %p449_p1 = scmp.lt.u32.totalorder %s610_s24, %s727_s0  ;;  %p450_p2 = scmp.lt.u32.totalorder %s448_s4, %s443_s29 }
  0x14   : > { %p446_p13 = pnand %p445_p12, %p444_p11  ;;  %p452_p4 = scmp.lt.u32.totalorder %s443_s29, %s610_s24 }
  0x15   : > { %p451_p3 = por %p450_p2, %p449_p1 }
  0x16   : > { %p447_p0 = pneg %p446_p13 }
  0x17   : > { %p453_p5 = por %p452_p4, %p451_p3 }
  0x19   : > { %p454_p6 = pnand %p453_p5, %p447_p0 }
  0x1b   : > { %457 = shalt.err (!%p454_p6)
}
  0x1c   : > { %s458_s7 = scalar_lea.vmem %s614_s26, 1024  ;;  %s543_s8 = smov [#allocation2]  }
  0x1d   : > { %p459_p11 = scmp.ne.s32.totalorder %s614_s26, %s458_s7  ;;  %s463_s9 = sshll.u32 %s543_s8, 4  ;;  %s464_s9 = int_to_ptr.vmem [resolvable:$false] %s463_s9 }
  0x1e   : > { %s465_s15 = scalar_lea.vmem %s464_s9, 2048  ;;  %p466_p10 = scmp.lt.s32.totalorder %s614_s26, %s464_s9 }
  0x1f   : > { %p461_p13 = pnand %p459_p11, %p445_p12  ;;  %p467_p1 = scmp.lt.s32.totalorder %s465_s15, %s458_s7 }
  0x21   : > { %p462_p9 = pneg %p461_p13  ;;  %p468_p2 = por %p467_p1, %p466_p10 }
  0x23   : > { %p469_p3 = pnand %p468_p2, %p462_p9 }
  0x25   : > { %472 = shalt.err (!%p469_p3)
}
  0x26   : > { %400 = dma.hbm_to_vmem [thread:$0]  (!%p616_p8), %s610_s24, 1024, %s614_s26, %s115_s28  }
  0x27   : > { %p733_p0 = scmp.lt.s32.totalorder %s541_s12, 3  ;;  %p734_p4 = scmp.ge.s32.totalorder %s541_s12, 1 }
  0x28   : > { %s661_s25 = scalar_lea.hbm %s728_s1, %s391_s21  ;;  %s137_s29 = scalar_lea.vmem [#allocation4], %s379_s20 }
  0x29   : > { %p652_p5 = pnand %p734_p4, %p733_p0  ;;  %s145_s30 = sshll.u32 %s137_s29, 4  ;;  %s146_s30 = int_to_ptr.vmem [resolvable:$true] %s145_s30 }
  0x2a   : > { %s134_s24 = scalar_lea.sflag [#allocation5], %s601_s19  ;;  %s473_s26 = scalar_lea.hbm %s661_s25, 1024 }
  0x2b   : > { %s735_s16 = scalar_select %p652_p5, 1, 0 }
  0x2c   : > { %p474_p9 = scmp.ne.s32.totalorder %s661_s25, %s473_s26  ;;  %s478_s21 = scalar_lea.hbm %s728_s1, 2048 }
  0x2d   : > { %p479_p11 = scmp.lt.u32.totalorder %s661_s25, %s728_s1  ;;  %p480_p13 = scmp.lt.u32.totalorder %s478_s21, %s473_s26 }
  0x2e   : > { %p476_p10 = pnand %p474_p9, %p445_p12  ;;  %p482_p2 = scmp.lt.u32.totalorder %s473_s26, %s661_s25 }
  0x2f   : > { %p481_p1 = por %p480_p13, %p479_p11 }
  0x30   : > { %p477_p6 = pneg %p476_p10 }
  0x31   : > { %p483_p3 = por %p482_p2, %p481_p1 }
  0x33   : > { %p484_p0 = pnand %p483_p3, %p477_p6 }
  0x35   : > { %487 = shalt.err (!%p484_p0)
}
  0x36   : > { %s488_s19 = scalar_lea.vmem %s146_s30, 1024  ;;  %s544_s20 = smov [#allocation4]  }
  0x37   : > { %p489_p4 = scmp.ne.s32.totalorder %s146_s30, %s488_s19  ;;  %s493_s5 = sshll.u32 %s544_s20, 4  ;;  %s494_s5 = int_to_ptr.vmem [resolvable:$false] %s493_s5 }
  0x38   : > { %s495_s6 = scalar_lea.vmem %s494_s5, 2048  ;;  %p496_p7 = scmp.lt.s32.totalorder %s146_s30, %s494_s5 }
  0x39   : > { %p491_p9 = pnand %p489_p4, %p445_p12  ;;  %p497_p5 = scmp.lt.s32.totalorder %s495_s6, %s488_s19 }
  0x3b   : > { %p492_p10 = pneg %p491_p9  ;;  %p498_p11 = por %p497_p5, %p496_p7 }
  0x3d   : > { %p499_p13 = pnand %p498_p11, %p492_p10 }
  0x3f   : > { %502 = shalt.err (!%p499_p13)
}
  0x40   : > { %403 = dma.hbm_to_vmem [thread:$0]  (!%p616_p8), %s661_s25, 1024, %s146_s30, %s134_s24  }
  0x41   : > { %p736_p6 = scmp.ne.s32.totalorder %s735_s16, 0 }
  0x42   : > { %s156_s7 = sand.u32 (!%p736_p6), 1, %s533_s10   ;;  %p737_p12 = scmp.ne.s32.totalorder (!%p736_p6), %s731_s18, 0 }
  0x43   : > { %154 = sbr.rel (%p736_p6) target bundleno = 294 (0x126), region = 28  ;;  %s386_s8 = sshll.u32 (!%p736_p6), %s156_s7, 6 }
  0x44   : > { %s157_s9 = scalar_lea.sflag (!%p736_p6), [#allocation3], %s156_s7  ;;  %s688_s15 = scalar_lea.vmem (!%p736_p6), [#allocation2], %s386_s8 }
  0x4a   : > { %520 = dma.done.wait (%p737_p12), %s157_s9, 1024  }
  0x4b   : > { %522 = vsyncadd (%p737_p12), %s157_s9, 4294966272  ;;  %s166_s22 = scalar_lea.sflag [#allocation5], %s156_s7  ;;  %s169_s27 = scalar_lea.vmem [#allocation4], %s386_s8 }
  0x4c   : > { %524 = dma.done.wait (%p737_p12), %s166_s22, 1024  }
  0x4d   : > { %526 = vsyncadd (%p737_p12), %s166_s22, 4294966272  ;;  %v206_v0 = vld [vmem:[%s169_s27] sm:$0xff]  ;;  %v207_v1 = vld [vmem:[%s169_s27 + $0x8] sm:$0xff]  ;;  %vm228_vm0 = vcmask 850944   ;;  %p194_p7 = scmp.lt.s32.totalorder %s579_s13, 1  ;;  %vm286_vm1 = vcmask 7168  }
  0x4e   : > { %v208_v2 = vld [vmem:[%s169_s27 + $0x10] sm:$0xff]  ;;  %v209_v3 = vld [vmem:[%s169_s27 + $0x18] sm:$0xff]  ;;  %v233_v4 = vmul.f32 %v206_v0, %v206_v0  ;;  %v234_v5 = vmul.f32 %v207_v1, %v207_v1  ;;  %v210_v7 = vld [vmem:[%s169_s27 + $0x20] sm:$0xff] }
  0x4f   : > { %v235_v6 = vmul.f32 %v208_v2, %v208_v2  ;;  %v198_v8 = vld [vmem:[%s688_s15] sm:$0xff]  ;;  %v236_v9 = vmul.f32 %v209_v3, %v209_v3  ;;  %v199_v11 = vld [vmem:[%s688_s15 + $0x8] sm:$0xff]  ;;  %v200_v12 = vld [vmem:[%s688_s15 + $0x10] sm:$0xff]  ;;  %v237_v19 = vmul.f32 %v210_v7, %v210_v7  ;;  %s743_s13 = smov (!%p194_p7, %s579_s13), 1 }
  0x50   : > { %v241_v10 = vadd.f32 %v234_v5, %v233_v4  ;;  %v201_v13 = vld [vmem:[%s688_s15 + $0x18] sm:$0xff]  ;;  %v214_v14 = vmul.f32 %v206_v0, %v198_v8  ;;  %v211_v15 = vld [vmem:[%s169_s27 + $0x28] sm:$0xff]  ;;  %v215_v16 = vmul.f32 %v207_v1, %v199_v11  ;;  %v216_v17 = vmul.f32 %v208_v2, %v200_v12  ;;  %v202_v21 = vld [vmem:[%s688_s15 + $0x20] sm:$0xff]  ;;  %s388_s18 = sshll.u32 %s743_s13, 3 }
  0x51   : > { %v213_v18 = vld [vmem:[%s169_s27 + $0x38] sm:$0xff]  ;;  %v251_v22 = vmul.f32 %v198_v8, %v198_v8  ;;  %v212_v23 = vld [vmem:[%s169_s27 + $0x30] sm:$0xff]  ;;  %v217_v24 = vmul.f32 %v209_v3, %v201_v13  ;;  %v252_v26 = vmul.f32 %v199_v11, %v199_v11  ;;  %v238_v27 = vmul.f32 %v211_v15, %v211_v15  ;;  %v203_v29 = vld [vmem:[%s688_s15 + $0x28] sm:$0xff]  ;;  %s197_s25 = scalar_lea.vmem %s729_s2, %s388_s18 }
  0x52   : > { %v242_v20 = vadd.f32 %v241_v10, %v235_v6  ;;  %v222_v25 = vadd.f32 %v215_v16, %v214_v14  ;;  %v253_v30 = vmul.f32 %v200_v12, %v200_v12  ;;  %v240_v31 = vmul.f32 %v213_v18, %v213_v18  ;;  %v205_v32 = vld [vmem:[%s688_s15 + $0x38] sm:$0xff]  ;;  %v204_v37 = vld [vmem:[%s688_s15 + $0x30] sm:$0xff] }
  0x53   : > { %v218_v33 = vmul.f32 %v210_v7, %v202_v21  ;;  %v239_v35 = vmul.f32 %v212_v23, %v212_v23  ;;  %v254_v38 = vmul.f32 %v201_v13, %v201_v13  ;;  %v259_v39 = vadd.f32 %v252_v26, %v251_v22 }
  0x54   : > { %v243_v28 = vadd.f32 %v242_v20, %v236_v9  ;;  %v223_v34 = vadd.f32 %v222_v25, %v216_v17  ;;  %v219_v40 = vmul.f32 %v211_v15, %v203_v29  ;;  %v221_v43 = vmul.f32 %v213_v18, %v205_v32 }
  0x55   : > { %v255_v44 = vmul.f32 %v202_v21, %v202_v21  ;;  %v260_v45 = vadd.f32 %v259_v39, %v253_v30  ;;  %v247_v46 = vsel %vm228_vm0, %v240_v31, 0.0  ;;  %v220_v47 = vmul.f32 %v212_v23, %v204_v37 }
  0x56   : > { %v244_v36 = vadd.f32 %v243_v28, %v237_v19  ;;  %v224_v41 = vadd.f32 %v223_v34, %v217_v24  ;;  %v256_v50 = vmul.f32 %v203_v29, %v203_v29  ;;  %v258_v53 = vmul.f32 %v205_v32, %v205_v32 }
  0x57   : > { %v261_v51 = vadd.f32 %v260_v45, %v254_v38  ;;  %v229_v55 = vsel %vm228_vm0, %v221_v43, 0.0  ;;  %v257_v56 = vmul.f32 %v204_v37, %v204_v37 }
  0x58   : > { %v245_v42 = vadd.f32 %v244_v36, %v238_v27  ;;  %v225_v48 = vadd.f32 %v224_v41, %v218_v33  ;;  %v265_v61 = vsel %vm228_vm0, %v258_v53, 0.0 }
  0x59   : > { %v262_v57 = vadd.f32 %v261_v51, %v255_v44 }
  0x5a   : > { %v246_v49 = vadd.f32 %v245_v42, %v239_v35  ;;  %v226_v52 = vadd.f32 %v225_v48, %v219_v40 }
  0x5b   : > { %v263_v59 = vadd.f32 %v262_v57, %v256_v50 }
  0x5c   : > { %v248_v54 = vadd.f32 %v247_v46, %v246_v49  ;;  %v227_v58 = vadd.f32 %v226_v52, %v220_v47 }
  0x5d   : > { %v264_v62 = vadd.f32 %v263_v59, %v257_v56 }
  0x5e   : > { %249 = vadd.xlane.f32.xlu0 %v248_v54  ;;  %v230_v60 = vadd.f32 %v229_v55, %v227_v58 }
  0x5f   : > { %v266_v63 = vadd.f32 %v265_v61, %v264_v62 }
  0x61   : > { %267 = vadd.xlane.f32.xlu1 %v266_v63 }
  0x62   : > { %231 = vadd.xlane.f32.xlu0 %v230_v60 }
  0xeb   : > { %v250_v0 = vpop.xlane.xlu0 %249 }
  0xec   : > { %v269_v1 = vadd.f32 1e-08, %v250_v0 }
  0xee   : > { %437 = vrcp.f32 %v269_v1  ;;  %v268_v7 = vpop.xlane.xlu1 %267 }
  0xef   : > { %v232_v2 = vpop.xlane.xlu0 %231 }
  0xf8   : > { %v438_v3 = vpop.eup %437 }
  0xf9   : > { %v271_v4 = vmul.f32 %v438_v3, %v232_v2 }
  0xfb   : > { %v272_v5 = vmul.f32 %v271_v4, %v271_v4  ;;  %v274_v6 = vmul.f32 2.0, %v271_v4 }
  0xfd   : > { %v275_v8 = vmul.f32 %v274_v6, %v232_v2  ;;  %v273_v9 = vmul.f32 %v272_v5, %v250_v0 }
  0xff   : > { %v276_v10 = vsub.f32 %v268_v7, %v275_v8 }
 0x101   : > { %v277_v11 = vadd.f32 %v276_v10, %v273_v9 }
 0x103   : > { %v278_v12 = vadd.f32 1e-08, %v277_v11 }
 0x105   : > { %439 = vrcp.f32 %v278_v12 }
 0x10f   : > { %v440_v13 = vpop.eup %439 }
 0x110   : > { %v280_v14 = vmul.f32 %v440_v13, %v273_v9 }
 0x112   : > { %v281_v15 = vadd.f32 1e-08, %v280_v14 }
 0x114   : > { %441 = vlog2.f32 %v281_v15 }
 0x11e   : > { %v442_v16 = vpop.eup %441 }
 0x11f   : > { %v283_v17 = vmul.f32 0.6931472, %v442_v16 }
 0x121   : > { %v284_v18 = vmul.f32 0.4342945, %v283_v17 }
 0x123   : > { %v285_v19 = vmul.f32 10.0, %v284_v18 }
 0x125   : > { %287 = vst.msk [vmem:[%s197_s25] sm:$0xff] %vm286_vm1, %v285_v19 }
 0x126 PF: > { %p15_p8 = scmp.ge.s32.totalorder %s582_s14, 4   ;;  %s738_s9 = smov %s533_s10 }
 0x127   : > { %s739_s10 = smov %s537_s11  ;;  %s740_s11 = smov %s592_s17 }
 0x128   : > { %s741_s12 = smov %s582_s14  ;;  %17 = sbr.rel (!%p15_p8) target bundleno = 5 (0x5), region = 81 }
 0x12f   :  { %307 = vsyncpa [#allocation3], 1 }
 0x130   :  { %309 = vsyncpa [#allocation3 + $0x1], 1 }
 0x131   :  { %310 = vsyncpa [#allocation5], 1 }
 0x132   :  { %312 = vsyncpa [#allocation5 + $0x1], 1 }

</bundles_post_ra>
